<compile_context>
chip_gen: v6e
topology: v6e:2x2x1
jax: 0.10.0
libtpu: 0.0.40
codegen_flags: <defaults>
</compile_context>

<pallas_src>
import jax
import jax.numpy as jnp
from jax.experimental import pallas as pl
from jax.experimental.pallas import tpu as pltpu


# ---------------------------------------------------------------------------
# Kernel A: attention + atten_combine + single LSTM step
# ---------------------------------------------------------------------------
def attn_lstm_kernel(emb_ref, h0_ref, c0_ref, enc_ref,
                     wae_ref, wah_ref, ba_ref,
                     wcomb_e_ref, wcomb_c_ref, bcomb_ref,
                     wih_ref, whh_ref, blstm_ref,
                     h_ref, c_ref, aw_ref, ctx_ref):
    emb = emb_ref[...]                                       # [B, E] f32
    h0 = h0_ref[...]                                         # [B, H] f32
    c0 = c0_ref[...]                                         # [B, H] f32
    H = h0.shape[-1]

    # ---- alignment scores: VPU multiply + lane reduce (no N=1 MXU matmul) ---
    # enc arrives as bf16 (halved HBM stream); cast lazily per use, reduce in f32.
    wae = wae_ref[...]                                       # [1, E] f32
    wah = wah_ref[...]                                       # [1, H] f32
    enc_part = jnp.sum(enc_ref[...].astype(jnp.float32) * wae[None, :, :],
                       axis=-1)                              # [B, T]
    hid_part = jnp.sum(h0 * wah, axis=-1, keepdims=True)     # [B, 1]
    # NOTE: like the original PyTorch module, padded encoder positions are NOT
    # masked out of the time softmax.
    logits = jnp.tanh(enc_part + hid_part + ba_ref[0, 0])    # [B, T]
    m = jnp.max(logits, axis=-1, keepdims=True)
    e = jnp.exp(logits - m)
    aw = e / jnp.sum(e, axis=-1, keepdims=True)              # [B, T]

    # ---- context: VPU multiply + sublane reduce over T (no M=1 batched bmm) -
    ctx = jnp.sum(aw[:, :, None] * enc_ref[...].astype(jnp.float32),
                  axis=1)                                    # [B, E]

    # ---- atten_combine + relu (bf16 weights/acts, f32 accumulation) ---------
    x = (jnp.dot(emb.astype(jnp.bfloat16), wcomb_e_ref[...],
                 preferred_element_type=jnp.float32)
         + jnp.dot(ctx.astype(jnp.bfloat16), wcomb_c_ref[...],
                   preferred_element_type=jnp.float32)
         + bcomb_ref[...])
    x = jnp.maximum(x, 0.0)                                  # [B, E]

    # ---- single LSTM step: 2 fused wide matmuls (N = 4H), gates i,f,g,o -----
    gates = (jnp.dot(x.astype(jnp.bfloat16), wih_ref[...],
                     preferred_element_type=jnp.float32)
             + jnp.dot(h0.astype(jnp.bfloat16), whh_ref[...],
                       preferred_element_type=jnp.float32)
             + blstm_ref[...])                               # [B, 4H]
    i_g = jax.nn.sigmoid(gates[:, 0 * H:1 * H])
    f_g = jax.nn.sigmoid(gates[:, 1 * H:2 * H])
    g_g = jnp.tanh(gates[:, 2 * H:3 * H])
    o_g = jax.nn.sigmoid(gates[:, 3 * H:4 * H])
    c_new = f_g * c0 + i_g * g_g
    h_new = o_g * jnp.tanh(c_new)

    h_ref[...] = h_new
    c_ref[...] = c_new
    aw_ref[...] = aw
    ctx_ref[...] = ctx


# ---------------------------------------------------------------------------
# Kernel B: vocab projection (tiled over padded V; int8 weights, f32 accumulate)
# ---------------------------------------------------------------------------
def vocab_proj_kernel(ctx_ref, h_ref, wqc_ref, wqh_ref, sc_ref, sh_ref,
                      bout_ref, logits_ref):
    # int8 weights halve the dominant HBM stream; the per-column scale is
    # applied once to the f32 accumulator (matmul is linear in weight columns).
    ctx = ctx_ref[...]                                       # [B, E] f32
    h = h_ref[...]                                           # [B, H] f32
    acc_c = jnp.dot(ctx, wqc_ref[...].astype(jnp.float32),
                    preferred_element_type=jnp.float32)
    acc_h = jnp.dot(h, wqh_ref[...].astype(jnp.float32),
                    preferred_element_type=jnp.float32)
    logits_ref[...] = acc_c * sc_ref[...] + acc_h * sh_ref[...] + bout_ref[...]


# ---------------------------------------------------------------------------
# Kernel C: vocab softmax (padded columns carry -1e30 bias -> exp underflows to 0)
# TODO(synk): could fuse into kernel B with a VMEM-resident output block to
# save the small [B,V] logits HBM round trip (kept separate to preserve the
# "parallel" V-tile sharding across TensorCores).
# ---------------------------------------------------------------------------
def softmax_kernel(logits_ref, probs_ref):
    logits = logits_ref[...]
    m = jnp.max(logits, axis=-1, keepdims=True)
    e = jnp.exp(logits - m)
    probs_ref[...] = e / jnp.sum(e, axis=-1, keepdims=True)


# ---------------------------------------------------------------------------
# One-time weight preprocessing (hoisted out of the per-step decode path)
# ---------------------------------------------------------------------------
def _round_up(x, m):
    return ((x + m - 1) // m) * m


def _vmem_capacity_bytes():
    try:
        cap = int(pltpu.get_tpu_info().vmem_capacity_bytes)
        if cap > 0:
            return cap
    except Exception:
        pass
    return 64 << 20  # conservative fallback (v7x per-TC physical VMEM)


def _plan_vocab_tiling(V, E, H, vmem_cap, nominal_B=8):
    """Pick a lane-aligned vocab tile + padded vocab that fit VMEM with headroom."""
    vp128 = _round_up(max(V, 1), 128)
    budget = int(0.75 * vmem_cap)              # leave Mosaic internal-scratch headroom
    per_step_bytes = 350_000                   # ~0.35us grid-step overhead @ ~1 TB/s
    best = None
    for cand in (4096, 2048, 1024, 512, 256, 128):
        tv = min(cand, vp128)
        vp = _round_up(V, tv)
        need = (2 * (E + H) * tv               # int8 weight tiles, double-buffered
                + 2 * 3 * tv * 4               # scale + bias tiles, double-buffered
                + 2 * nominal_B * tv * 4       # f32 logits tiles, double-buffered
                + 2 * nominal_B * (E + H) * 4)  # resident f32 activations
        if int(1.25 * need) + (2 << 20) > budget:
            continue
        # cost = padded weight bytes streamed per step + per-grid-step overhead
        cost = vp * (E + H) + (vp // tv) * per_step_bytes
        if best is None or cost < best[0]:
            best = (cost, tv, vp)
    if best is None:                           # pathological budget: smallest tile
        tv = min(128, vp128)
        best = (0, tv, _round_up(V, tv))
    return best[1], best[2]


def prepare_params(params, vmem_cap=None):
    E = params['w_comb'].shape[0]
    H = params['w_hh'].shape[1]
    V = params['w_out'].shape[0]
    if vmem_cap is None:
        vmem_cap = _vmem_capacity_bytes()

    tv, Vp = _plan_vocab_tiling(V, E, H, vmem_cap)
    pad = Vp - V

    # --- int8 symmetric per-column quantization of the vocab projection ------
    wout_c = jnp.pad(params['w_out'][:, :E].T, ((0, 0), (0, pad)))   # [E, Vp]
    wout_h = jnp.pad(params['w_out'][:, E:].T, ((0, 0), (0, pad)))   # [H, Vp]

    def quantize(w):
        amax = jnp.max(jnp.abs(w), axis=0, keepdims=True)            # [1, Vp]
        scale = jnp.where(amax > 0, amax / 127.0, 1.0).astype(jnp.float32)
        wq = jnp.clip(jnp.round(w / scale), -127, 127).astype(jnp.int8)
        return wq, scale

    wout_c_q, scale_c = quantize(wout_c)
    wout_h_q, scale_h = quantize(wout_h)
    bout = jnp.concatenate(
        [params['b_out'].astype(jnp.float32),
         jnp.full((pad,), -1e30, jnp.float32)]).reshape(1, Vp)

    w_align = params['w_align']                    # [1, E+H], concat = (enc, hidden)
    return {
        'embedding': params['embedding'],
        'wae': w_align[:, :E].astype(jnp.float32),                    # [1, E]
        'wah': w_align[:, E:].astype(jnp.float32),                    # [1, H]
        'ba': params['b_align'].reshape(1, 1).astype(jnp.float32),    # scalar -> SMEM
        'wcomb_e': params['w_comb'][:, :E].T.astype(jnp.bfloat16),    # [E, E]
        'wcomb_c': params['w_comb'][:, E:].T.astype(jnp.bfloat16),    # [E, E]
        'bcomb': params['b_comb'].reshape(1, E).astype(jnp.float32),
        'wih': params['w_ih'].T.astype(jnp.bfloat16),                 # [E, 4H], i|f|g|o
        'whh': params['w_hh'].T.astype(jnp.bfloat16),                 # [H, 4H]
        'blstm': (params['b_ih'] + params['b_hh']).reshape(1, 4 * H).astype(jnp.float32),
        'wout_c_q': wout_c_q,                                         # [E, Vp] int8
        'wout_h_q': wout_h_q,                                         # [H, Vp] int8
        'scale_c': scale_c,                                           # [1, Vp] f32
        'scale_h': scale_h,                                           # [1, Vp] f32
        'bout': bout,                                                 # [1, Vp] f32
        'v_tile': int(tv),
        'v_orig': int(V),
        'vmem_cap': int(vmem_cap),
        'dropout_p': params['dropout_p'],
    }


# ---------------------------------------------------------------------------
# Forward wrapper (mirrors AttentionDecoder.forward)
# ---------------------------------------------------------------------------
def attention_decoder_forward(prepped, input_ids, pre_hidden, pre_cell_state,
                              encoder_outputs, flag=True, dropout_key=None):
    """input_ids [B,1] int32, pre_hidden [B,1,H], pre_cell_state [1,B,H],
    encoder_outputs = (enc [B,T,E], source_lens).
    Returns (probs [B,V], hidden [B,1,H], cell [1,B,H], attn [B,1,T])."""
    enc = encoder_outputs[0]
    B, T, E = enc.shape
    H = pre_hidden.shape[-1]
    V = prepped['v_orig']
    Vp = prepped['wout_c_q'].shape[-1]
    tv = prepped['v_tile']
    nv = Vp // tv
    cap = prepped['vmem_cap']

    # ---- glue: embedding gather + (training-only) dropout --------------------
    # TODO(synk): fuse the per-step row gather + dropout into kernel A via
    # scalar-prefetched ids + manual DMA gather and pltpu.prng_*; also amortize
    # kernel-A weight re-streaming across decode steps (cross-call prefetch).
    emb = jnp.take(prepped['embedding'], input_ids[:, 0], axis=0).astype(jnp.float32)
    if flag:
        # Mirrors the PyTorch module as written: nn.Dropout(keep_prob) drops
        # each unit with probability == keep_prob, scales survivors by 1/(1-p).
        p_drop = prepped['dropout_p']
        keep = 1.0 - p_drop
        mask = jax.random.bernoulli(dropout_key, keep, emb.shape).astype(emb.dtype)
        emb = emb * mask / keep

    h0 = pre_hidden[:, 0, :].astype(jnp.float32)      # [B, H]
    c0 = pre_cell_state[0].astype(jnp.float32)        # [B, H]
    enc_b = enc.astype(jnp.bfloat16)                  # halve the [B,T,E] HBM stream

    vmem = pl.BlockSpec(memory_space=pltpu.MemorySpace.VMEM)
    smem = pl.BlockSpec(memory_space=pltpu.MemorySpace.SMEM)

    # ---- kernel A: attention + combine + LSTM step ---------------------------
    need_a = (B * T * E * 2                                   # bf16 enc
              + (2 * E * E + E * 4 * H + H * 4 * H) * 2       # bf16 weights
              + B * (3 * E + 4 * H + T) * 4                   # f32 activations/outs
              + (E + 4 * H) * 4)                              # f32 biases
    vmem_a = max(16 << 20, min(4 * need_a + (8 << 20), int(0.75 * cap)))

    h_new, c_new, aw, ctx = pl.pallas_call(
        attn_lstm_kernel,
        out_shape=(jax.ShapeDtypeStruct((B, H), jnp.float32),
                   jax.ShapeDtypeStruct((B, H), jnp.float32),
                   jax.ShapeDtypeStruct((B, T), jnp.float32),
                   jax.ShapeDtypeStruct((B, E), jnp.float32)),
        in_specs=[vmem, vmem, vmem, vmem,     # emb, h0, c0, enc
                  vmem, vmem, smem,           # wae, wah, ba (scalar in SMEM)
                  vmem, vmem, vmem,           # wcomb_e, wcomb_c, bcomb
                  vmem, vmem, vmem],          # wih, whh, blstm
        out_specs=(vmem, vmem, vmem, vmem),
        compiler_params=pltpu.CompilerParams(vmem_limit_bytes=int(vmem_a)),
    )(emb, h0, c0, enc_b,
      prepped['wae'], prepped['wah'], prepped['ba'],
      prepped['wcomb_e'], prepped['wcomb_c'], prepped['bcomb'],
      prepped['wih'], prepped['whh'], prepped['blstm'])

    # ---- kernel B: vocab projection, gridded & parallel over padded V --------
    need_b = (2 * (E + H) * tv                # int8 weight tiles, double-buffered
              + 2 * 3 * tv * 4                # scale/bias tiles, double-buffered
              + 2 * B * tv * 4                # f32 logits tiles, double-buffered
              + 2 * B * (E + H) * 4)          # resident activations
    vmem_b = max(16 << 20, min(2 * need_b + (8 << 20), int(0.75 * cap)))

    logits = pl.pallas_call(
        vocab_proj_kernel,
        out_shape=jax.ShapeDtypeStruct((B, Vp), jnp.float32),
        grid=(nv,),
        in_specs=[pl.BlockSpec((B, E), lambda j: (0, 0)),
                  pl.BlockSpec((B, H), lambda j: (0, 0)),
                  pl.BlockSpec((E, tv), lambda j: (0, j)),
                  pl.BlockSpec((H, tv), lambda j: (0, j)),
                  pl.BlockSpec((1, tv), lambda j: (0, j)),
                  pl.BlockSpec((1, tv), lambda j: (0, j)),
                  pl.BlockSpec((1, tv), lambda j: (0, j))],
        out_specs=pl.BlockSpec((B, tv), lambda j: (0, j)),
        compiler_params=pltpu.CompilerParams(
            dimension_semantics=("parallel",),
            vmem_limit_bytes=int(vmem_b)),
    )(ctx, h_new, prepped['wout_c_q'], prepped['wout_h_q'],
      prepped['scale_c'], prepped['scale_h'], prepped['bout'])

    # ---- kernel C: vocab softmax (padded cols have -1e30 logits -> 0 prob) ---
    vmem_c = max(16 << 20, min(4 * B * Vp * 4 + (4 << 20), int(0.75 * cap)))
    probs_p = pl.pallas_call(
        softmax_kernel,
        out_shape=jax.ShapeDtypeStruct((B, Vp), jnp.float32),
        in_specs=[vmem],
        out_specs=vmem,
        compiler_params=pltpu.CompilerParams(vmem_limit_bytes=int(vmem_c)),
    )(logits)
    probs = probs_p[:, :V]

    current_hidden = h_new[:, None, :]                # [B, 1, H]
    current_cell_state = c_new[None, :, :]            # [1, B, H]
    attention_weights = aw[:, None, :]                # [B, 1, T]
    return probs, current_hidden, current_cell_state, attention_weights


def init_params(key, vocab_size, embedding_size, hidden_size, output_size, keep_prob):
    ks = jax.random.split(key, 10)
    E, H, V = embedding_size, hidden_size, output_size
    s = 0.1
    return {
        'embedding': s * jax.random.normal(ks[0], (vocab_size, E), jnp.float32),
        'w_align': s * jax.random.normal(ks[1], (1, E + H), jnp.float32),  # in = E(enc)+H(hid)
        'b_align': s * jax.random.normal(ks[2], (1,), jnp.float32),
        'w_comb': s * jax.random.normal(ks[3], (E, 2 * E), jnp.float32),
        'b_comb': s * jax.random.normal(ks[4], (E,), jnp.float32),
        'w_ih': s * jax.random.normal(ks[5], (4 * H, E), jnp.float32),
        'w_hh': s * jax.random.normal(ks[6], (4 * H, H), jnp.float32),
        'b_ih': s * jax.random.normal(ks[7], (4 * H,), jnp.float32),
        'b_hh': s * jax.random.normal(ks[8], (4 * H,), jnp.float32),
        'w_out': s * jax.random.normal(ks[9], (V, E + H), jnp.float32),
        'b_out': jnp.zeros((V,), jnp.float32),
        'dropout_p': keep_prob,   # torch code passes keep_prob as nn.Dropout's p
    }


if __name__ == "__main__":
    # NOTE: B maps to sublanes/MXU rows; callers should aggregate beams/streams
    # into the batch (>=8 rows) at production shapes for better utilization.
    B, T = 2, 8
    E, H, V = 16, 32, 24
    vocab = 50

    key = jax.random.PRNGKey(0)
    k_par, k_enc, k_h, k_c, k_in = jax.random.split(key, 5)

    params = init_params(k_par, vocab, E, H, V, keep_prob=0.1)
    prepped = prepare_params(params)     # one-time weight prep (outside decode loop)

    input_ids = jax.random.randint(k_in, (B, 1), 0, vocab, dtype=jnp.int32)
    pre_hidden = 0.1 * jax.random.normal(k_h, (B, 1, H), jnp.float32)
    pre_cell_state = 0.1 * jax.random.normal(k_c, (1, B, H), jnp.float32)
    enc_outputs = 0.1 * jax.random.normal(k_enc, (B, T, E), jnp.float32)
    source_lens = jnp.full((B,), T, jnp.int32)

    # flag=False -> eval path (deterministic, no dropout), as in inference.
    probs, cur_h, cur_c, attn = attention_decoder_forward(
        prepped, input_ids, pre_hidden, pre_cell_state,
        (enc_outputs, source_lens), flag=False)

    jax.block_until_ready((probs, cur_h, cur_c, attn))
    assert probs.shape == (B, V) and cur_h.shape == (B, 1, H)
    assert cur_c.shape == (1, B, H) and attn.shape == (B, 1, T)

    # Pure-JAX f32 reference for a correctness sanity check.
    def reference(p, ids, ph, pc, enc):
        emb = p['embedding'][ids[:, 0]]
        h0 = ph[:, 0, :]
        c0 = pc[0]
        Bq, Tq, Eq = enc.shape
        Hq = h0.shape[-1]
        cat = jnp.concatenate([enc, jnp.broadcast_to(h0[:, None, :], (Bq, Tq, Hq))], axis=2)
        al = jnp.tanh(jnp.einsum('btk,k->bt', cat, p['w_align'][0]) + p['b_align'][0])
        aw_r = jax.nn.softmax(al, axis=1)
        ctx_r = jnp.einsum('bt,bte->be', aw_r, enc)
        x = jax.nn.relu(jnp.concatenate([emb, ctx_r], 1) @ p['w_comb'].T + p['b_comb'])
        gates = x @ p['w_ih'].T + h0 @ p['w_hh'].T + p['b_ih'] + p['b_hh']
        i_g, f_g, g_g, o_g = [gates[:, k * Hq:(k + 1) * Hq] for k in range(4)]
        c_r = jax.nn.sigmoid(f_g) * c0 + jax.nn.sigmoid(i_g) * jnp.tanh(g_g)
        h_r = jax.nn.sigmoid(o_g) * jnp.tanh(c_r)
        out = jnp.concatenate([ctx_r, h_r], 1) @ p['w_out'].T + p['b_out']
        return jax.nn.softmax(out, axis=1), h_r, c_r, aw_r

    probs_r, h_r, c_r, aw_r = reference(params, input_ids, pre_hidden,
                                        pre_cell_state, enc_outputs)
    assert float(jnp.max(jnp.abs(cur_h[:, 0, :] - h_r))) < 5e-3
    assert float(jnp.max(jnp.abs(cur_c[0] - c_r))) < 5e-3
    assert float(jnp.max(jnp.abs(attn[:, 0, :] - aw_r))) < 5e-3
    assert float(jnp.max(jnp.abs(probs - probs_r))) < 2e-2   # int8 w_out + bf16 kernel-A weights

    print("KERNEL_OK")
</pallas_src>

<mosaic_0001>
module attributes {stable_mosaic.version = 11 : i64} {
  func.func @attn_lstm_kernel(%arg0: memref<2x16xf32, #tpu.memory_space<vmem>>, %arg1: memref<2x32xf32, #tpu.memory_space<vmem>>, %arg2: memref<2x32xf32, #tpu.memory_space<vmem>>, %arg3: memref<2x8x16xbf16, #tpu.memory_space<vmem>>, %arg4: memref<1x16xf32, #tpu.memory_space<vmem>>, %arg5: memref<1x32xf32, #tpu.memory_space<vmem>>, %arg6: memref<1x1xf32, #tpu.memory_space<smem>>, %arg7: memref<16x16xbf16, #tpu.memory_space<vmem>>, %arg8: memref<16x16xbf16, #tpu.memory_space<vmem>>, %arg9: memref<1x16xf32, #tpu.memory_space<vmem>>, %arg10: memref<16x128xbf16, #tpu.memory_space<vmem>>, %arg11: memref<32x128xbf16, #tpu.memory_space<vmem>>, %arg12: memref<1x128xf32, #tpu.memory_space<vmem>>, %arg13: memref<2x32xf32, #tpu.memory_space<vmem>>, %arg14: memref<2x32xf32, #tpu.memory_space<vmem>>, %arg15: memref<2x8xf32, #tpu.memory_space<vmem>>, %arg16: memref<2x16xf32, #tpu.memory_space<vmem>>) attributes {dimension_semantics = [], scalar_prefetch = 0 : i64, scratch_operands = 0 : i64, tpu.core_type = #tpu.core_type<tc>} {
    %c0 = arith.constant 0 : index
    %c0_0 = arith.constant 0 : index
    %0 = vector.load %arg0[%c0, %c0_0] : memref<2x16xf32, #tpu.memory_space<vmem>>, vector<2x16xf32>
    %c0_1 = arith.constant 0 : index
    %c0_2 = arith.constant 0 : index
    %1 = vector.load %arg1[%c0_1, %c0_2] : memref<2x32xf32, #tpu.memory_space<vmem>>, vector<2x32xf32>
    %c0_3 = arith.constant 0 : index
    %c0_4 = arith.constant 0 : index
    %2 = vector.load %arg2[%c0_3, %c0_4] : memref<2x32xf32, #tpu.memory_space<vmem>>, vector<2x32xf32>
    %c0_5 = arith.constant 0 : index
    %c0_6 = arith.constant 0 : index
    %3 = vector.load %arg4[%c0_5, %c0_6] : memref<1x16xf32, #tpu.memory_space<vmem>>, vector<1x16xf32>
    %c0_7 = arith.constant 0 : index
    %c0_8 = arith.constant 0 : index
    %4 = vector.load %arg5[%c0_7, %c0_8] : memref<1x32xf32, #tpu.memory_space<vmem>>, vector<1x32xf32>
    %c0_9 = arith.constant 0 : index
    %c0_10 = arith.constant 0 : index
    %c0_11 = arith.constant 0 : index
    %5 = vector.load %arg3[%c0_9, %c0_10, %c0_11] : memref<2x8x16xbf16, #tpu.memory_space<vmem>>, vector<2x8x16xbf16>
    %6 = arith.extf %5 : vector<2x8x16xbf16> to vector<2x8x16xf32>
    %7 = vector.shape_cast %3 : vector<1x16xf32> to vector<1x1x16xf32>
    %8 = vector.broadcast %7 : vector<1x1x16xf32> to vector<2x8x16xf32>
    %9 = arith.mulf %6, %8 : vector<2x8x16xf32>
    %cst = arith.constant dense<0.000000e+00> : vector<2x8xf32>
    %10 = vector.multi_reduction <add>, %9, %cst [2] : vector<2x8x16xf32> to vector<2x8xf32>
    %11 = vector.broadcast %4 : vector<1x32xf32> to vector<2x32xf32>
    %12 = arith.mulf %1, %11 : vector<2x32xf32>
    %cst_12 = arith.constant dense<0.000000e+00> : vector<2xf32>
    %13 = vector.multi_reduction <add>, %12, %cst_12 [1] : vector<2x32xf32> to vector<2xf32>
    %14 = vector.shape_cast %13 : vector<2xf32> to vector<2x1xf32>
    %15 = vector.broadcast %14 : vector<2x1xf32> to vector<2x8xf32>
    %16 = arith.addf %10, %15 : vector<2x8xf32>
    %c0_13 = arith.constant 0 : index
    %c0_14 = arith.constant 0 : index
    %17 = memref.load %arg6[%c0_13, %c0_14] : memref<1x1xf32, #tpu.memory_space<smem>>
    %18 = vector.broadcast %17 : f32 to vector<2x8xf32>
    %19 = arith.addf %16, %18 : vector<2x8xf32>
    %20 = math.tanh %19 : vector<2x8xf32>
    %cst_15 = arith.constant dense<0xFF800000> : vector<2xf32>
    %21 = vector.multi_reduction <maximumf>, %20, %cst_15 [1] : vector<2x8xf32> to vector<2xf32>
    %22 = vector.shape_cast %21 : vector<2xf32> to vector<2x1xf32>
    %23 = vector.broadcast %22 : vector<2x1xf32> to vector<2x8xf32>
    %24 = arith.subf %20, %23 : vector<2x8xf32>
    %25 = math.exp %24 : vector<2x8xf32>
    %cst_16 = arith.constant dense<0.000000e+00> : vector<2xf32>
    %26 = vector.multi_reduction <add>, %25, %cst_16 [1] : vector<2x8xf32> to vector<2xf32>
    %27 = vector.shape_cast %26 : vector<2xf32> to vector<2x1xf32>
    %28 = vector.broadcast %27 : vector<2x1xf32> to vector<2x8xf32>
    %29 = arith.divf %25, %28 : vector<2x8xf32>
    %30 = vector.shape_cast %29 : vector<2x8xf32> to vector<2x8x1xf32>
    %c0_17 = arith.constant 0 : index
    %c0_18 = arith.constant 0 : index
    %c0_19 = arith.constant 0 : index
    %31 = vector.load %arg3[%c0_17, %c0_18, %c0_19] : memref<2x8x16xbf16, #tpu.memory_space<vmem>>, vector<2x8x16xbf16>
    %32 = arith.extf %31 : vector<2x8x16xbf16> to vector<2x8x16xf32>
    %33 = vector.broadcast %30 : vector<2x8x1xf32> to vector<2x8x16xf32>
    %34 = arith.mulf %33, %32 : vector<2x8x16xf32>
    %cst_20 = arith.constant dense<0.000000e+00> : vector<2x16xf32>
    %35 = vector.multi_reduction <add>, %34, %cst_20 [1] : vector<2x8x16xf32> to vector<2x16xf32>
    %36 = arith.truncf %0 : vector<2x16xf32> to vector<2x16xbf16>
    %c0_21 = arith.constant 0 : index
    %c0_22 = arith.constant 0 : index
    %37 = vector.load %arg7[%c0_21, %c0_22] : memref<16x16xbf16, #tpu.memory_space<vmem>>, vector<16x16xbf16>
    %cst_23 = arith.constant dense<0.000000e+00> : vector<2x16xf32>
    %38 = tpu.matmul %36, %37, %cst_23 {dimension_numbers = #tpu.dot_dimension_numbers<[1], [0], [0], [1], [0, 0, 1, 1], [], []>} : vector<2x16xbf16>, vector<16x16xbf16>, vector<2x16xf32> -> vector<2x16xf32>
    %39 = arith.truncf %35 : vector<2x16xf32> to vector<2x16xbf16>
    %c0_24 = arith.constant 0 : index
    %c0_25 = arith.constant 0 : index
    %40 = vector.load %arg8[%c0_24, %c0_25] : memref<16x16xbf16, #tpu.memory_space<vmem>>, vector<16x16xbf16>
    %cst_26 = arith.constant dense<0.000000e+00> : vector<2x16xf32>
    %41 = tpu.matmul %39, %40, %cst_26 {dimension_numbers = #tpu.dot_dimension_numbers<[1], [0], [0], [1], [0, 0, 1, 1], [], []>} : vector<2x16xbf16>, vector<16x16xbf16>, vector<2x16xf32> -> vector<2x16xf32>
    %42 = arith.addf %38, %41 : vector<2x16xf32>
    %c0_27 = arith.constant 0 : index
    %c0_28 = arith.constant 0 : index
    %43 = vector.load %arg9[%c0_27, %c0_28] : memref<1x16xf32, #tpu.memory_space<vmem>>, vector<1x16xf32>
    %44 = vector.broadcast %43 : vector<1x16xf32> to vector<2x16xf32>
    %45 = arith.addf %42, %44 : vector<2x16xf32>
    %cst_29 = arith.constant 0.000000e+00 : f32
    %46 = vector.broadcast %cst_29 : f32 to vector<2x16xf32>
    %47 = arith.maximumf %45, %46 : vector<2x16xf32>
    %48 = arith.truncf %47 : vector<2x16xf32> to vector<2x16xbf16>
    %c0_30 = arith.constant 0 : index
    %c0_31 = arith.constant 0 : index
    %49 = vector.load %arg10[%c0_30, %c0_31] : memref<16x128xbf16, #tpu.memory_space<vmem>>, vector<16x128xbf16>
    %cst_32 = arith.constant dense<0.000000e+00> : vector<2x128xf32>
    %50 = tpu.matmul %48, %49, %cst_32 {dimension_numbers = #tpu.dot_dimension_numbers<[1], [0], [0], [1], [0, 0, 1, 1], [], []>} : vector<2x16xbf16>, vector<16x128xbf16>, vector<2x128xf32> -> vector<2x128xf32>
    %51 = arith.truncf %1 : vector<2x32xf32> to vector<2x32xbf16>
    %c0_33 = arith.constant 0 : index
    %c0_34 = arith.constant 0 : index
    %52 = vector.load %arg11[%c0_33, %c0_34] : memref<32x128xbf16, #tpu.memory_space<vmem>>, vector<32x128xbf16>
    %cst_35 = arith.constant dense<0.000000e+00> : vector<2x128xf32>
    %53 = tpu.matmul %51, %52, %cst_35 {dimension_numbers = #tpu.dot_dimension_numbers<[1], [0], [0], [1], [0, 0, 1, 1], [], []>} : vector<2x32xbf16>, vector<32x128xbf16>, vector<2x128xf32> -> vector<2x128xf32>
    %54 = arith.addf %50, %53 : vector<2x128xf32>
    %c0_36 = arith.constant 0 : index
    %c0_37 = arith.constant 0 : index
    %55 = vector.load %arg12[%c0_36, %c0_37] : memref<1x128xf32, #tpu.memory_space<vmem>>, vector<1x128xf32>
    %56 = vector.broadcast %55 : vector<1x128xf32> to vector<2x128xf32>
    %57 = arith.addf %54, %56 : vector<2x128xf32>
    %58 = vector.extract_strided_slice %57 {offsets = [0, 0], sizes = [2, 32], strides = [1, 1]} : vector<2x128xf32> to vector<2x32xf32>
    %59 = arith.negf %58 : vector<2x32xf32>
    %60 = math.exp %59 : vector<2x32xf32>
    %cst_38 = arith.constant 1.000000e+00 : f32
    %61 = vector.broadcast %cst_38 : f32 to vector<2x32xf32>
    %62 = arith.addf %61, %60 : vector<2x32xf32>
    %63 = arith.divf %61, %62 : vector<2x32xf32>
    %64 = vector.extract_strided_slice %57 {offsets = [0, 32], sizes = [2, 32], strides = [1, 1]} : vector<2x128xf32> to vector<2x32xf32>
    %65 = arith.negf %64 : vector<2x32xf32>
    %66 = math.exp %65 : vector<2x32xf32>
    %cst_39 = arith.constant 1.000000e+00 : f32
    %67 = vector.broadcast %cst_39 : f32 to vector<2x32xf32>
    %68 = arith.addf %67, %66 : vector<2x32xf32>
    %69 = arith.divf %67, %68 : vector<2x32xf32>
    %70 = vector.extract_strided_slice %57 {offsets = [0, 64], sizes = [2, 32], strides = [1, 1]} : vector<2x128xf32> to vector<2x32xf32>
    %71 = math.tanh %70 : vector<2x32xf32>
    %72 = vector.extract_strided_slice %57 {offsets = [0, 96], sizes = [2, 32], strides = [1, 1]} : vector<2x128xf32> to vector<2x32xf32>
    %73 = arith.negf %72 : vector<2x32xf32>
    %74 = math.exp %73 : vector<2x32xf32>
    %cst_40 = arith.constant 1.000000e+00 : f32
    %75 = vector.broadcast %cst_40 : f32 to vector<2x32xf32>
    %76 = arith.addf %75, %74 : vector<2x32xf32>
    %77 = arith.divf %75, %76 : vector<2x32xf32>
    %78 = arith.mulf %69, %2 : vector<2x32xf32>
    %79 = arith.mulf %63, %71 : vector<2x32xf32>
    %80 = arith.addf %78, %79 : vector<2x32xf32>
    %81 = math.tanh %80 : vector<2x32xf32>
    %82 = arith.mulf %77, %81 : vector<2x32xf32>
    %c0_41 = arith.constant 0 : index
    %c0_42 = arith.constant 0 : index
    %83 = vector.load %arg13[%c0_41, %c0_42] : memref<2x32xf32, #tpu.memory_space<vmem>>, vector<2x32xf32>
    tpu.vector_store %arg13[%c0_41, %c0_42], %82 {strides = array<i32>} : memref<2x32xf32, #tpu.memory_space<vmem>>, vector<2x32xf32>,
    %c0_43 = arith.constant 0 : index
    %c0_44 = arith.constant 0 : index
    %84 = vector.load %arg14[%c0_43, %c0_44] : memref<2x32xf32, #tpu.memory_space<vmem>>, vector<2x32xf32>
    tpu.vector_store %arg14[%c0_43, %c0_44], %80 {strides = array<i32>} : memref<2x32xf32, #tpu.memory_space<vmem>>, vector<2x32xf32>,
    %c0_45 = arith.constant 0 : index
    %c0_46 = arith.constant 0 : index
    %85 = vector.load %arg15[%c0_45, %c0_46] : memref<2x8xf32, #tpu.memory_space<vmem>>, vector<2x8xf32>
    tpu.vector_store %arg15[%c0_45, %c0_46], %29 {strides = array<i32>} : memref<2x8xf32, #tpu.memory_space<vmem>>, vector<2x8xf32>,
    %c0_47 = arith.constant 0 : index
    %c0_48 = arith.constant 0 : index
    %86 = vector.load %arg16[%c0_47, %c0_48] : memref<2x16xf32, #tpu.memory_space<vmem>>, vector<2x16xf32>
    tpu.vector_store %arg16[%c0_47, %c0_48], %35 {strides = array<i32>} : memref<2x16xf32, #tpu.memory_space<vmem>>, vector<2x16xf32>,
    return
  }
}

</mosaic_0001>

<bundles_post_ra>
// kernel: tpu_custom_call.1
= control target key start
LH: loop header
LB: loop body
LE: loop exit
PB: predicated region body
PF: predicated region fallthrough
CT: control target
= control target key end

     0   :  { %s1245_s0 = inlined_call_operand.vmem [shape: f32[2,16], index: 0, kind: input, shape index: {}]   ;;  %s1246_s1 = inlined_call_operand.hbm [shape: f32[2,32], index: 1, kind: input, shape index: {}]   ;;  %s1247_s2 = inlined_call_operand.vmem [shape: f32[2,32], index: 2, kind: input, shape index: {}]   ;;  %s1248_s3 = inlined_call_operand.hbm [shape: bf16[2,8,16], index: 3, kind: input, shape index: {}]   ;;  %s1249_s4 = inlined_call_operand.hbm [shape: f32[1,16], index: 4, kind: input, shape index: {}]   ;;  %s1250_s5 = inlined_call_operand.hbm [shape: f32[1,32], index: 5, kind: input, shape index: {}]   ;;  %s1251_s6 = inlined_call_operand.<no memory space> [shape: f32[1,1], index: 6, kind: input, shape index: {}]   ;;  %s1252_s7 = inlined_call_operand.hbm [shape: bf16[16,16], index: 7, kind: input, shape index: {}]   ;;  %s1253_s8 = inlined_call_operand.hbm [shape: bf16[16,16], index: 8, kind: input, shape index: {}]   ;;  %s1254_s9 = inlined_call_operand.hbm [shape: f32[1,16], index: 9, kind: input, shape index: {}]   ;;  %s1255_s10 = inlined_call_operand.hbm [shape: bf16[16,128], index: 10, kind: input, shape index: {}]   ;;  %s1256_s11 = inlined_call_operand.vmem [shape: bf16[32,128], index: 11, kind: input, shape index: {}]   ;;  %s1257_s12 = inlined_call_operand.vmem [shape: f32[1,128], index: 12, kind: input, shape index: {}]   ;;  %s1258_s13 = inlined_call_operand.hbm [shape: f32[2,32], index: 13, kind: output, shape index: {0}]   ;;  %s1259_s14 = inlined_call_operand.hbm [shape: f32[2,32], index: 14, kind: output, shape index: {1}]   ;;  %s1260_s15 = inlined_call_operand.hbm [shape: f32[2,8], index: 15, kind: output, shape index: {2}]   ;;  %s1261_s16 = inlined_call_operand.hbm [shape: f32[2,16], index: 16, kind: output, shape index: {3}]  }
   0x1   :  { %1262 = sst [smem:[#allocation31_spill]] %s1245_s0 }
   0x2   :  { %23 = vsyncpa [#allocation4], 0 }
   0x3   :  { %24 = vsyncpa [#allocation7], 0 }
   0x4   :  { %25 = vsyncpa [#allocation10], 0 }
   0x5   :  { %26 = vsyncpa [#allocation13], 0 }
   0x6   :  { %27 = vsyncpa [#allocation16], 0 }
   0x7   :  { %28 = vsyncpa [#allocation5], 0 }
   0x8   :  { %29 = vsyncpa [#allocation19], 0 }
   0x9   :  { %30 = vsyncpa [#allocation22], 0  ;;  %s1023_s21 = smov [#allocation6]  }
   0xa   :  { %s50_s22 = sshll.u32 %s1023_s21, 4  ;;  %s51_s22 = int_to_ptr.vmem [resolvable:$true] %s50_s22 }
   0xb   :  { %s775_s23 = scalar_lea.vmem %s51_s22, 128  ;;  %p780_p1 = scmp.lt.s32.totalorder %s51_s22, %s51_s22 }
   0xc   :  { %p776_p0 = scmp.ne.s32.totalorder %s51_s22, %s775_s23  ;;  %p781_p2 = scmp.lt.s32.totalorder %s775_s23, %s775_s23 }
   0xe   :  { %p782_p3 = por %p781_p2, %p780_p1 }
  0x10   :  { %p783_p4 = pnand %p782_p3, %p776_p0 }
  0x12   :  { %786 = shalt.err (!%p783_p4)
}
  0x13   :  { %s1024_s24 = smov 64   ;;  %s1025_s25 = smov 4  }
  0x14   :  { %56 = dma.hbm_to_vmem [thread:$0]  %s1248_s3, 128, %s51_s22, [#allocation7], %s1024_s24, %s1024_s24, %s1025_s25  }
  0x15   :  { %s1026_s28 = smov [#allocation9]   ;;  %s1027_s30 = smov [#allocation12]  }
  0x16   :  { %s73_s29 = sshll.u32 %s1026_s28, 4  ;;  %s96_s0 = sshll.u32 %s1027_s30, 4  ;;  %s74_s29 = int_to_ptr.vmem [resolvable:$true] %s73_s29  ;;  %s97_s0 = int_to_ptr.vmem [resolvable:$true] %s96_s0 }
  0x17   :  { %s795_s17 = scalar_lea.vmem %s74_s29, 16  ;;  %s799_s18 = scalar_lea.vmem %s74_s29, 32 }
  0x18   :  { %p796_p5 = scmp.ne.s32.totalorder %s74_s29, %s795_s17  ;;  %p800_p6 = scmp.lt.s32.totalorder %s74_s29, %s74_s29 }
  0x19   :  { %p801_p7 = scmp.lt.s32.totalorder %s799_s18, %s795_s17 }
  0x1b   :  { %p802_p8 = por %p801_p7, %p800_p6 }
  0x1d   :  { %p803_p9 = pnand %p802_p8, %p796_p5 }
  0x1f   :  { %806 = shalt.err (!%p803_p9)
}
  0x20   :  { %76 = dma.hbm_to_vmem [thread:$0]  %s1250_s5, 16, %s74_s29, [#allocation10]  }
  0x21   :  { %s815_s21 = scalar_lea.vmem %s97_s0, 128  ;;  %p820_p11 = scmp.lt.s32.totalorder %s97_s0, %s97_s0 }
  0x22   :  { %p816_p10 = scmp.ne.s32.totalorder %s97_s0, %s815_s21  ;;  %p821_p12 = scmp.lt.s32.totalorder %s815_s21, %s815_s21 }
  0x24   :  { %p822_p13 = por %p821_p12, %p820_p11 }
  0x26   :  { %p823_p0 = pnand %p822_p13, %p816_p10 }
  0x28   :  { %826 = shalt.err (!%p823_p0)
}
  0x29   :  { %102 = dma.hbm_to_vmem [thread:$0]  %s1253_s8, 128, %s97_s0, [#allocation13], %s1024_s24, %s1024_s24, %s1025_s25  }
  0x2a   :  { %s1028_s23 = smov [#allocation3]   ;;  %s1029_s27 = smov [#allocation8]  }
  0x2b   :  { %s39_s26 = sshll.u32 %s1028_s23, 4  ;;  %s63_s5 = sshll.u32 %s1029_s27, 4  ;;  %s40_s26 = int_to_ptr.vmem [resolvable:$true] %s39_s26  ;;  %s64_s5 = int_to_ptr.vmem [resolvable:$true] %s63_s5 }
  0x2c   :  { %s835_s28 = scalar_lea.vmem %s40_s26, 32  ;;  %p840_p2 = scmp.lt.s32.totalorder %s40_s26, %s40_s26 }
  0x2d   :  { %p836_p1 = scmp.ne.s32.totalorder %s40_s26, %s835_s28  ;;  %p841_p3 = scmp.lt.s32.totalorder %s835_s28, %s835_s28 }
  0x2f   :  { %p842_p4 = por %p841_p3, %p840_p2 }
  0x31   :  { %p843_p5 = pnand %p842_p4, %p836_p1 }
  0x33   :  { %846 = shalt.err (!%p843_p5)
}
  0x34   :  { %42 = dma.hbm_to_vmem [thread:$0]  %s1246_s1, 32, %s40_s26, [#allocation4]  }
  0x35   :  { %s855_s17 = scalar_lea.vmem %s64_s5, 16  ;;  %s859_s8 = scalar_lea.vmem %s64_s5, 32 }
  0x36   :  { %p856_p6 = scmp.ne.s32.totalorder %s64_s5, %s855_s17  ;;  %p860_p7 = scmp.lt.s32.totalorder %s64_s5, %s64_s5 }
  0x37   :  { %p861_p8 = scmp.lt.s32.totalorder %s859_s8, %s855_s17 }
  0x39   :  { %p862_p9 = por %p861_p8, %p860_p7 }
  0x3b   :  { %p863_p10 = pnand %p862_p9, %p856_p6 }
  0x3d   :  { %866 = shalt.err (!%p863_p10)
}
  0x3e   :  { %66 = dma.hbm_to_vmem [thread:$0]  %s1249_s4, 16, %s64_s5, [#allocation7]  }
  0x3f   :  { %s1030_s19 = smov [#allocation11]   ;;  %s1031_s21 = smov [#allocation14]  }
  0x40   :  { %s84_s20 = sshll.u32 %s1030_s19, 4  ;;  %s109_s3 = sshll.u32 %s1031_s21, 4  ;;  %s85_s20 = int_to_ptr.vmem [resolvable:$true] %s84_s20  ;;  %s110_s3 = int_to_ptr.vmem [resolvable:$true] %s109_s3 }
  0x41   :  { %s875_s22 = scalar_lea.vmem %s85_s20, 128  ;;  %p880_p12 = scmp.lt.s32.totalorder %s85_s20, %s85_s20 }
  0x42   :  { %p876_p11 = scmp.ne.s32.totalorder %s85_s20, %s875_s22  ;;  %p881_p13 = scmp.lt.s32.totalorder %s875_s22, %s875_s22 }
  0x44   :  { %p882_p0 = por %p881_p13, %p880_p12 }
  0x46   :  { %p883_p1 = pnand %p882_p0, %p876_p11 }
  0x48   :  { %886 = shalt.err (!%p883_p1)
}
  0x49   :  { %90 = dma.hbm_to_vmem [thread:$0]  %s1252_s7, 128, %s85_s20, [#allocation10], %s1024_s24, %s1024_s24, %s1025_s25  }
  0x4a   :  { %s895_s4 = scalar_lea.vmem %s110_s3, 16  ;;  %s899_s26 = scalar_lea.vmem %s110_s3, 32 }
  0x4b   :  { %p896_p2 = scmp.ne.s32.totalorder %s110_s3, %s895_s4  ;;  %p900_p3 = scmp.lt.s32.totalorder %s110_s3, %s110_s3 }
  0x4c   :  { %p901_p4 = scmp.lt.s32.totalorder %s899_s26, %s895_s4 }
  0x4e   :  { %p902_p5 = por %p901_p4, %p900_p3 }
  0x50   :  { %p903_p6 = pnand %p902_p5, %p896_p2 }
  0x52   :  { %906 = shalt.err (!%p903_p6)
}
  0x53   :  { %112 = dma.hbm_to_vmem [thread:$0]  %s1254_s9, 16, %s110_s3, [#allocation13]  }
  0x54   :  { %s1032_s28 = smov [#allocation15]  }
  0x55   :  { %s118_s29 = sshll.u32 %s1032_s28, 4  ;;  %s119_s29 = int_to_ptr.vmem [resolvable:$true] %s118_s29 }
  0x56   :  { %s915_s30 = scalar_lea.vmem %s119_s29, 128  ;;  %p920_p8 = scmp.lt.s32.totalorder %s119_s29, %s119_s29 }
  0x57   :  { %p916_p7 = scmp.ne.s32.totalorder %s119_s29, %s915_s30  ;;  %p921_p9 = scmp.lt.s32.totalorder %s915_s30, %s915_s30 }
  0x59   :  { %p922_p10 = por %p921_p9, %p920_p8 }
  0x5b   :  { %p923_p11 = pnand %p922_p10, %p916_p7 }
  0x5d   :  { %926 = shalt.err (!%p923_p11)
}
  0x5e   :  { %124 = dma.hbm_to_vmem [thread:$0]  %s1255_s10, 128, %s119_s29, [#allocation16], %s1024_s24, %s1024_s24, %s1025_s25  }
  0x5f   :  { %1007 = dma.done.wait [#allocation4], 32  }
  0x60   :  { %1008 = vsyncadd [#allocation4], 4294967264 }
  0x61   :  { %1009 = dma.done.wait [#allocation7], 144  }
  0x62   :  { %1010 = vsyncadd [#allocation7], 4294967152 }
  0x63   :  { %1011 = dma.done.wait [#allocation10], 144  }
  0x64   :  { %1012 = vsyncadd [#allocation10], 4294967152 }
  0x65   :  { %1013 = dma.done.wait [#allocation13], 144  }
  0x66   :  { %1014 = vsyncadd [#allocation13], 4294967152 }
  0x67   :  { %1015 = dma.done.wait [#allocation16], 128  }
  0x68   :  { %1016 = vsyncadd [#allocation16], 4294967168  ;;  %v190_v0 = vlaneseq  ;;  %vm185_vm0 = vcmask 254976   ;;  %v1165_v4 = vld [vmem:[#allocation3] sm:$0x3]  ;;  %v1168_v8 = vld [vmem:[#allocation6] sm:$0xff]   ;;  %v203_v22 = vstv %s1251_s6 }
  0x69   :  { %v669_v5 = vld [vmem:[#allocation9] ss:$0 sm:$0xff]  ;;  %v668_v6 = vld [vmem:[#allocation8] ss:$0 sm:$0xff]  ;;  %v685_v9 = vunpack.c.h.bf16 %v1168_v8  ;;  %v684_v10 = vunpack.c.l.bf16 %v1168_v8  ;;  %vm171_vm1 = vcmask 130048   ;;  %v1033_v16 = vmov 0  }
  0x6a   :  { %v191_v1 = vshrl.u32 %v190_v0, 7  ;;  %v217_v2 = vand.u32 127, %v190_v0  ;;  %v184_v7 = vmul.f32 %v669_v5, %v1165_v4  ;;  %741 = vset.pattern.permute.xlu0 %v1033_v16  ;;  %740 = vset.pattern.permute.xlu1 %v1033_v16  ;;  %vm226_vm2 = vcmask 1041409   ;;  %v742_v59 = vld [vmem:[#allocation11] sm:$0xff]   ;;  %s1263_s8 = sld [smem:[#allocation31_spill]]  ;;  %v743_v63 = vld [vmem:[#allocation12] sm:$0xff]  }
  0x6b   :  { %v170_v12 = vmul.f32 %v685_v9, %v668_v6  ;;  %v169_v13 = vmul.f32 %v684_v10, %v668_v6  ;;  %vm229_vm3 = vcmask 58368   ;;  %v1034_v60 = vmov 0.0   ;;  %s1036_s1 = smov 32  }
  0x6c   :  { %v1163_v3 = vsub.s32 %v217_v2, %v191_v1  ;;  %v186_v11 = vsel %vm185_vm0, %v184_v7, 0.0  ;;  %v196_v17 = vsub.s32 1, %v191_v1  ;;  %v192_v18 = vsub.s32 0, %v191_v1  ;;  %701 = vmatprep.subr.bf16.mxu1 %v1034_v60  ;;  %695 = vmatprep.subr.bf16.mxu0 %v1034_v60 }
  0x6d   :  { %187 = vadd.xlane.f32.xlu0 %v186_v11  ;;  %v175_v14 = vsel %vm171_vm1, %v170_v12, 0.0  ;;  %v172_v15 = vsel %vm171_vm1, %v169_v13, 0.0  ;;  %702 = vmatpush3.bf16.msra.mxu1 %v742_v59  ;;  %vm1035_vm4 = vmmov 0   ;;  %vm606_vm5 = vcmask 123904  }
  0x6e   :  { %176 = vadd.xlane.f32.xlu1 %v175_v14  ;;  %715 = vmatprep.subr.bf16.mxu1 %v1034_v60  ;;  %vm452_vm6 = vcmask 261120  }
  0x6f   :  { %703 = vmatprep.mubr.msk.bf16.mxu1 %vm1035_vm4, %v1034_v60  ;;  %697 = vmatprep.mubr.msk.bf16.mxu0 %vm1035_vm4, %v1034_v60 }
  0x70   :  { %v154_v61 = vld [vmem:[%s1263_s8] sm:$0x3]  ;;  %696 = vmatpush3.bf16.msra.mxu0 %v743_v63 }
  0x71   :  { %173 = vadd.xlane.f32.xlu0 %v172_v15  ;;  %v312_v62 = vpack.c.bf16 %v154_v61, %v154_v61  ;;  %707 = vmatprep.subr.bf16.mxu0 %v1034_v60 }
  0x73   :  { %704 = vmatmul.mubr.msk.bf16.vlgmr.msra.gmra.mxu1 %vm171_vm1, %v312_v62 }
  0x74   :  { %717 = vmatprep.mubr.msk.bf16.mxu1 %vm1035_vm4, %v1034_v60 }
  0xf6   :  { %v188_v19 = vpop.xlane.xlu0 %187 }
  0xf7   :  { %v197_v20 = vrot.slane %v188_v19, %v196_v17  ;;  %v193_v21 = vrot.slane %v188_v19, %v192_v18  ;;  %v177_v23 = vpop.xlane.xlu1 %176 }
  0xf9   :  { %v201_v24 = vadd.f32 %v197_v20, %v177_v23 }
  0xfa   :  { %v174_v25 = vpop.xlane.xlu0 %173 }
  0xfb   :  { %v200_v26 = vadd.f32 %v193_v21, %v174_v25  ;;  %v205_v27 = vadd.f32 %v203_v22, %v201_v24 }
  0xfd   :  { %v204_v28 = vadd.f32 %v203_v22, %v200_v26  ;;  %747 = vtanh.f32 %v205_v27 }
  0xff   :  { %749 = vtanh.f32 %v204_v28  ;;  %v744_v28 = vld [vmem:[%s1256_s11 + $0x8] sm:$0xff]  }
 0x10a   :  { %v748_v29 = vpop.eup %747 }
 0x10b   :  { %214 = vperm.xlu0 %741, %v748_v29  }
 0x10c   :  { %v750_v30 = vpop.eup %749 }
 0x10d   :  { %211 = vperm.xlu1 %740, %v750_v30  }
 0x186   :  { %v215_v31 = vpop.permute.xlu0 %214 }
 0x187   :  { %v225_v33 = vrot.slane %v215_v31, %v1163_v3 }
 0x188   :  { %v212_v32 = vpop.permute.xlu1 %211 }
 0x189   :  { %v221_v34 = vrot.slane %v212_v32, %v1163_v3 }
 0x18b   :  { %v227_v35 = vsel %vm226_vm2, %v225_v33, %v221_v34  ;;  %v745_v33 = vld [vmem:[%s1256_s11] sm:$0xff]   ;;  %v435_v34 = vpack.c.bf16 %v1165_v4, %v1165_v4 }
 0x18c   :  { %v230_v36 = vsel %vm229_vm3, %v227_v35, -inf }
 0x18d   :  { %231 = vmax.xlane.f32.xlu1 %v230_v36  ;;  %v746_v36 = vld [vmem:[#allocation15] sm:$0xff]  }
 0x18e   :  { %716 = vmatpush3.bf16.msra.mxu1 %v746_v36 }
 0x216   :  { %v232_v37 = vpop.xlane.xlu1 %231 }
 0x217   :  { %v237_v38 = vrot.slane %v232_v37, %v192_v18  ;;  %v241_v39 = vrot.slane %v232_v37, %v196_v17 }
 0x219   :  { %v244_v40 = vsub.f32 %v750_v30, %v237_v38  ;;  %v245_v41 = vsub.f32 %v748_v29, %v241_v39  ;;  %v417_v30 = vpop.f32.mrf.mxu1  ;;  %v674_v38 = vld [vmem:[#allocation14] ss:$0 sm:$0xff] }
 0x21b   :  { %v246_v42 = vmul.f32 1.442695, %v244_v40  ;;  %v248_v43 = vmul.f32 1.442695, %v245_v41  ;;  %v705_v31 = vpop.f32.mrf.mxu1 }
 0x21d   :  { %751 = vpow2.f32 %v246_v42  ;;  %v420_v32 = vpop.f32.mrf.mxu1 }
 0x21e   :  { %753 = vpow2.f32 %v248_v43 }
 0x21f   :  { %v706_v35 = vpop.f32.mrf.mxu1 }
 0x22a   :  { %v752_v44 = vpop.eup %751 }
 0x22b   :  { %253 = vperm.xlu0 %741, %v752_v44   ;;  %v754_v45 = vpop.eup %753 }
 0x22f   :  { %256 = vperm.xlu0 %741, %v754_v45  }
 0x2a6   :  { %v254_v46 = vpop.permute.xlu0 %253 }
 0x2a7   :  { %v261_v48 = vrot.slane %v254_v46, %v1163_v3 }
 0x2aa   :  { %v257_v47 = vpop.permute.xlu0 %256 }
 0x2ab   :  { %v265_v49 = vrot.slane %v257_v47, %v1163_v3 }
 0x2ad   :  { %v266_v50 = vsel %vm226_vm2, %v265_v49, %v261_v48 }
 0x2ae   :  { %v268_v51 = vsel %vm229_vm3, %v266_v50, 0.0  ;;  %v680_v50 = vld [vmem:[%s1257_s12] ss:$0 sm:$0xff]  ;;  %s1037_s12 = smov 96  }
 0x2af   :  { %269 = vadd.xlane.f32.xlu1 %v268_v51 }
 0x338   :  { %v270_v52 = vpop.xlane.xlu1 %269 }
 0x339   :  { %v275_v53 = vrot.slane %v270_v52, %v192_v18  ;;  %v279_v54 = vrot.slane %v270_v52, %v196_v17 }
 0x33b   :  { %755 = vrcp.f32 %v275_v53 }
 0x33c   :  { %757 = vrcp.f32 %v279_v54 }
 0x348   :  { %v756_v55 = vpop.eup %755 }
 0x349   :  { %v758_v56 = vpop.eup %757  ;;  %v283_v57 = vmul.f32 %v756_v55, %v752_v44 }
 0x34a   :  { %v285_v58 = vmul.f32 %v758_v56, %v754_v45 }
 0x34b   :  { %288 = vperm.xlu0 %741, %v283_v57   ;;  %v156_v57 = vld [vmem:[%s1247_s2] sm:$0x3]  ;;  %s1038_s2 = smov [#allocation18]  }
 0x34c   :  { %293 = vperm.xlu1 %740, %v285_v58   ;;  %s624_s23 = sshll.u32 %s1038_s2, 4  ;;  %s625_s23 = int_to_ptr.vmem [resolvable:$true] %s624_s23 }
 0x34d   :  { %s927_s4 = scalar_lea.vmem %s625_s23, 32  ;;  %p932_p13 = scmp.lt.s32.totalorder %s625_s23, %s625_s23 }
 0x34e   :  { %p928_p12 = scmp.ne.s32.totalorder %s625_s23, %s927_s4  ;;  %p933_p0 = scmp.lt.s32.totalorder %s927_s4, %s927_s4 }
 0x350   :  { %p934_p1 = por %p933_p0, %p932_p13 }
 0x352   :  { %p935_p2 = pnand %p934_p1, %p928_p12 }
 0x3c6   :  { %v289_v0 = vpop.permute.xlu0 %288 }
 0x3c7   :  { %v294_v1 = vpop.permute.xlu1 %293  ;;  %v296_v2 = vmul.f32 %v684_v10, %v289_v0  ;;  %v594_v5 = vrot.slane %v289_v0, %v1163_v3 }
 0x3c8   :  { %v297_v6 = vmul.f32 %v685_v9, %v294_v1  ;;  %v598_v7 = vrot.slane %v294_v1, %v1163_v3 }
 0x3c9   :  { %v298_v11 = vsel %vm171_vm1, %v296_v2, 0.0 }
 0x3ca   :  { %v305_v12 = vsel %vm171_vm1, %v297_v6, 0.0  ;;  %v299_v13 = vrot.slane %v298_v11, 4  ;;  %v599_v14 = vsel %vm226_vm2, %v598_v7, %v594_v5 }
 0x3cb   :  { %v306_v15 = vrot.slane %v305_v12, 4  ;;  %601 = vst.msk [vmem:[#allocation20] sm:$0x3] %vm229_vm3, %v599_v14 }
 0x3cc   :  { %v300_v16 = vadd.f32 %v299_v13, %v298_v11 }
 0x3cd   :  { %v307_v17 = vadd.f32 %v306_v15, %v305_v12 }
 0x3ce   :  { %v301_v10 = vrot.slane %v300_v16, 2 }
 0x3cf   :  { %v308_v18 = vrot.slane %v307_v17, 2 }
 0x3d0   :  { %v302_v19 = vadd.f32 %v301_v10, %v300_v16 }
 0x3d1   :  { %v309_v20 = vadd.f32 %v308_v18, %v307_v17 }
 0x3d2   :  { %v303_v8 = vrot.slane %v302_v19, 1 }
 0x3d3   :  { %v310_v9 = vrot.slane %v309_v20, 1 }
 0x3d4   :  { %v304_v21 = vadd.f32 %v303_v8, %v302_v19 }
 0x3d5   :  { %v311_v3 = vadd.f32 %v310_v9, %v309_v20 }
 0x3d6   :  { %v315_v22 = vpack.c.bf16 %v304_v21, %v304_v21 }
 0x3d7   :  { %v316_v23 = vpack.c.bf16 %v311_v3, %v311_v3  ;;  %v604_v24 = vsel %vm226_vm2, %v311_v3, %v304_v21 }
 0x3d8   :  { %v321_v25 = vunpack.c.l.b16 %v315_v22  ;;  %607 = vst.msk [vmem:[#allocation21] sm:$0x3] %vm606_vm5, %v604_v24 }
 0x3d9   :  { %v322_v26 = vunpack.c.l.b16 %v316_v23 }
 0x3db   :  { %v323_v27 = vsel %vm226_vm2, %v322_v26, %v321_v25 }
 0x3dc   :  { %v324_v29 = vpack.c.b16 %v323_v27, %v323_v27 }
 0x3de   :  { %698 = vmatmul.mubr.msk.bf16.vlgmr.msra.gmra.mxu0 %vm171_vm1, %v324_v29 }
 0x3df   :  { %708 = vmatpush3.bf16.msra.mxu0 %v744_v28  ;;  %711 = vmatprep.mubr.msk.bf16.mxu0 %vm1035_vm4, %v1034_v60 }
 0x3e0   :  { %709 = vmatprep.subr.bf16.mxu0 %v1034_v60 }
 0x3e3   :  { %710 = vmatpush3.bf16.msra.mxu0 %v745_v33 }
 0x3e6   :  { %712 = vmatmul.mubr.msk.bf16.vlgmr.msra.gmra.mxu0 %vm452_vm6, %v435_v34 }
 0x49e   :  { %v368_v37 = vpop.f32.mrf.mxu0 }
 0x49f   :  { %v418_v39 = vadd.f32 %v417_v30, %v368_v37 }
 0x4a0   :  { %v699_v40 = vpop.f32.mrf.mxu0 }
 0x4a1   :  { %v430_v41 = vadd.f32 %v674_v38, %v418_v39 }
 0x4a2   :  { %v371_v42 = vpop.f32.mrf.mxu0 }
 0x4a3   :  { %v431_v43 = vmax.f32 %v430_v41, 0.0 }
 0x4a4   :  { %v700_v44 = vpop.f32.mrf.mxu0 }
 0x4a5   :  { %v432_v45 = vpack.c.bf16 %v431_v43, %v431_v43 }
 0x4a6   :  { %v490_v46 = vpop.f32.mrf.mxu0 }
 0x4a7   :  { %718 = vmatmul.mubr.msk.bf16.vlgmr.msra.gmra.mxu1 %vm171_vm1, %v432_v45 }
 0x4a8   :  { %v713_v47 = vpop.f32.mrf.mxu0 }
 0x4aa   :  { %v493_v4 = vpop.f32.mrf.mxu0 }
 0x4ac   :  { %v714_v48 = vpop.f32.mrf.mxu0 }
 0x567   :  { %v539_v49 = vpop.f32.mrf.mxu1 }
 0x568   :  { %v540_v51 = vadd.f32 %v539_v49, %v490_v46 }
 0x569   :  { %v719_v52 = vpop.f32.mrf.mxu1 }
 0x56a   :  { %v552_v53 = vadd.f32 %v680_v50, %v540_v51 }
 0x56b   :  { %v542_v54 = vpop.f32.mrf.mxu1 }
 0x56c   :  { %759 = vtanh.f32 %v552_v53  ;;  %v681_v58 = vmul.f32 -1.442695, %v552_v53 }
 0x56d   :  { %v720_v55 = vpop.f32.mrf.mxu1 }
 0x56e   :  { %761 = vpow2.f32 %v681_v58 }
 0x579   :  { %v760_v56 = vpop.eup %759 }
 0x57a   :  { %566 = vrot.lane.b32.xlu0 %v760_v56, %s1024_s24 }
 0x57b   :  { %v762_v59 = vpop.eup %761 }
 0x57c   :  { %v556_v60 = vadd.f32 1.0, %v762_v59 }
 0x57e   :  { %561 = vrot.lane.b32.xlu0 %v156_v57, %s1036_s1  ;;  %763 = vrcp.f32 %v556_v60 }
 0x58b   :  { %v764_v61 = vpop.eup %763 }
 0x5ec   :  { %v567_v62 = vpop.permute.xlu0 %566 }
 0x5ed   :  { %v569_v63 = vmul.f32 %v764_v61, %v567_v62 }
 0x5ef   :  { %571 = vrot.lane.b32.xlu0 %v569_v63, %s1036_s1 }
 0x5f0   :  { %v562_v0 = vpop.permute.xlu0 %561 }
 0x5f1   :  { %v564_v1 = vmul.f32 %v764_v61, %v562_v0 }
 0x661   :  { %v572_v2 = vpop.permute.xlu0 %571 }
 0x662   :  { %v574_v5 = vadd.f32 %v572_v2, %v564_v1 }
 0x664   :  { %765 = vtanh.f32 %v574_v5  ;;  %587 = vrot.lane.b32.xlu1 %v574_v5, %s1037_s12 }
 0x671   :  { %v766_v6 = vpop.eup %765 }
 0x672   :  { %577 = vrot.lane.b32.xlu0 %v766_v6, %s1024_s24 }
 0x6d6   :  { %v588_v7 = vpop.permute.xlu1 %587 }
 0x6d7   :  { %590 = vst.msk [vmem:[#allocation18] sm:$0x3] %vm185_vm0, %v588_v7 }
 0x6d8   :  { %938 = shalt.err (!%p935_p2)
}
 0x6d9   :  { %627 = dma.vmem_to_hbm [thread:$0]  %s625_s23, 32, %s1259_s14, [#allocation19]  }
 0x6da   :  { %s1039_s5 = smov [#allocation20]   ;;  %s1040_s24 = smov [#allocation21]  }
 0x6db   :  { %s634_s28 = sshll.u32 %s1039_s5, 4  ;;  %s644_s29 = sshll.u32 %s1040_s24, 4  ;;  %s635_s28 = int_to_ptr.vmem [resolvable:$true] %s634_s28  ;;  %s645_s29 = int_to_ptr.vmem [resolvable:$true] %s644_s29 }
 0x6dc   :  { %s947_s30 = scalar_lea.vmem %s635_s28, 32  ;;  %p952_p4 = scmp.lt.s32.totalorder %s635_s28, %s635_s28 }
 0x6dd   :  { %p948_p3 = scmp.ne.s32.totalorder %s635_s28, %s947_s30  ;;  %p953_p5 = scmp.lt.s32.totalorder %s947_s30, %s947_s30 }
 0x6df   :  { %p954_p6 = por %p953_p5, %p952_p4 }
 0x6e1   :  { %p955_p7 = pnand %p954_p6, %p948_p3 }
 0x6e3   :  { %958 = shalt.err (!%p955_p7)
}
 0x6e4   :  { %637 = dma.vmem_to_hbm [thread:$0]  %s635_s28, 32, %s1260_s15, [#allocation19]  }
 0x6e5   :  { %s967_s9 = scalar_lea.vmem %s645_s29, 32  ;;  %p972_p9 = scmp.lt.s32.totalorder %s645_s29, %s645_s29 }
 0x6e6   :  { %p968_p8 = scmp.ne.s32.totalorder %s645_s29, %s967_s9  ;;  %p973_p10 = scmp.lt.s32.totalorder %s967_s9, %s967_s9 }
 0x6e8   :  { %p974_p11 = por %p973_p10, %p972_p9 }
 0x6ea   :  { %p975_p12 = pnand %p974_p11, %p968_p8 }
 0x6ec   :  { %978 = shalt.err (!%p975_p12)
}
 0x6ed   :  { %647 = dma.vmem_to_hbm [thread:$0]  %s645_s29, 32, %s1261_s16, [#allocation22]   ;;  %v578_v11 = vpop.permute.xlu0 %577 }
 0x6ee   :  { %v580_v12 = vmul.f32 %v764_v61, %v578_v11  ;;  %s1041_s6 = smov [#allocation17]  }
 0x6ef   :  { %s614_s25 = sshll.u32 %s1041_s6, 4  ;;  %s615_s25 = int_to_ptr.vmem [resolvable:$true] %s614_s25 }
 0x6f0   :  { %582 = vrot.lane.b32.xlu0 %v580_v12, %s1036_s1  ;;  %s987_s15 = scalar_lea.vmem %s615_s25, 32  ;;  %p992_p0 = scmp.lt.s32.totalorder %s615_s25, %s615_s25 }
 0x6f1   :  { %p988_p13 = scmp.ne.s32.totalorder %s615_s25, %s987_s15  ;;  %p993_p1 = scmp.lt.s32.totalorder %s987_s15, %s987_s15 }
 0x6f3   :  { %p994_p2 = por %p993_p1, %p992_p0 }
 0x6f5   :  { %p995_p3 = pnand %p994_p2, %p988_p13 }
 0x762   :  { %v583_v13 = vpop.permute.xlu0 %582 }
 0x763   :  { %585 = vst.msk [vmem:[#allocation17] sm:$0x3] %vm185_vm0, %v583_v13 }
 0x764   :  { %998 = shalt.err (!%p995_p3)
}
 0x765   :  { %617 = dma.vmem_to_hbm [thread:$0]  %s615_s25, 32, %s1258_s13, [#allocation5]  }
 0x766   :  { %1017 = dma.done.wait [#allocation5], 32  }
 0x767   :  { %1018 = vsyncadd [#allocation5], 4294967264 }
 0x768   :  { %1019 = dma.done.wait [#allocation19], 64  }
 0x769   :  { %1020 = vsyncadd [#allocation19], 4294967232 }
 0x76a   :  { %1021 = dma.done.wait [#allocation22], 32  }
 0x76b   :  { %1022 = vsyncadd [#allocation22], 4294967264 }
 0x76c   :  { %660 = vsyncpa [#allocation4], 1 }
 0x76d   :  { %661 = vsyncpa [#allocation7], 1 }
 0x76e   :  { %662 = vsyncpa [#allocation10], 1 }
 0x76f   :  { %663 = vsyncpa [#allocation13], 1 }
 0x770   :  { %664 = vsyncpa [#allocation16], 1 }
 0x771   :  { %665 = vsyncpa [#allocation5], 1 }
 0x772   :  { %666 = vsyncpa [#allocation19], 1 }
 0x773   :  { %667 = vsyncpa [#allocation22], 1 }

</bundles_post_ra>
